<compile_context>
chip_gen: v7x
topology: tpu7x:2x2x1
jax: 0.10.0
libtpu: 0.0.40
codegen_flags: <defaults>
</compile_context>

<pallas_src>
import jax
import jax.numpy as jnp
from jax.experimental import pallas as pl
from jax.experimental.pallas import tpu as pltpu


D_IN, H1, H2, D_OUT = 28 * 28, 512, 256, 10
D_IN_PAD = 896     # 784 -> 7*128, lane-aligned fc1 contraction dim
D_OUT_PAD = 128    # 10  -> 128,  lane-dense fc3 output / store width
BN_EPS = 1e-5
NEG_PAD = -1e30    # pad-column bias -> exp(pad) == 0 in the softmax


def _round_up(x, m):
    return (x + m - 1) // m * m


def mlp_kernel(x_ref, w1_ref, b1_ref, w2_ref, b2_ref, w3_ref, b3_ref, o_ref):
    # fc1 (+ folded BN1) + ReLU : bf16 MXU operands, f32 accumulate/elementwise.
    h1 = jnp.dot(x_ref[...], w1_ref[...], preferred_element_type=jnp.float32)
    h1 = jnp.maximum(h1 + b1_ref[...], 0.0)
    # dropout(p=0.5, training=False) -> identity

    # fc2 (+ folded BN2) + ReLU
    h2 = jnp.dot(h1.astype(jnp.bfloat16), w2_ref[...],
                 preferred_element_type=jnp.float32)
    h2 = jnp.maximum(h2 + b2_ref[...], 0.0)
    # dropout(p=0.5, training=False) -> identity

    # fc3 (output padded to 128 lanes; pad bias = -1e30) + log_softmax(dim=1)
    logits = jnp.dot(h2.astype(jnp.bfloat16), w3_ref[...],
                     preferred_element_type=jnp.float32) + b3_ref[...]
    m = jnp.max(logits, axis=-1, keepdims=True)
    lse = jnp.log(jnp.sum(jnp.exp(logits - m), axis=-1, keepdims=True)) + m
    o_ref[...] = logits - lse


def net_forward(x_nchw, params):
    """x_nchw: (B, 1, 28, 28) float32. Returns (B, 10) log-probabilities."""
    (w1, b1, g1, be1, m1, v1,
     w2, b2, g2, be2, m2, v2,
     w3, b3) = params

    B = x_nchw.shape[0]
    x = x_nchw.reshape(B, D_IN).astype(jnp.float32)   # torch .view(-1, 784)

    # Fold BatchNorm (running stats, eval mode) into the linear weights/biases:
    #   (x@W + b)*s + t  ==  x@(W*s) + (b*s + t)
    s1 = g1 / jnp.sqrt(v1 + BN_EPS)
    t1 = be1 - m1 * s1
    s2 = g2 / jnp.sqrt(v2 + BN_EPS)
    t2 = be2 - m2 * s2
    w1f = w1 * s1[None, :]
    b1f = b1 * s1 + t1
    w2f = w2 * s2[None, :]
    b2f = b2 * s2 + t2

    # Pad fc1 contraction dim to 896 and fc3 output to 128 lanes.
    w1p = jnp.zeros((D_IN_PAD, H1), jnp.float32).at[:D_IN, :].set(w1f)
    w3p = jnp.zeros((H2, D_OUT_PAD), jnp.float32).at[:, :D_OUT].set(w3)
    b3p = jnp.full((D_OUT_PAD,), NEG_PAD, jnp.float32).at[:D_OUT].set(b3)

    # Batch tiling: TB rows per grid step (multiple of 8, <= 512).
    TB = min(512, _round_up(B, 8))
    B_pad = _round_up(B, TB)
    xp = jnp.zeros((B_pad, D_IN_PAD), jnp.float32).at[:B, :D_IN].set(x)

    # bf16 MXU operands; biases stay f32 row vectors.
    xp = xp.astype(jnp.bfloat16)
    w1b = w1p.astype(jnp.bfloat16)
    w2b = w2f.astype(jnp.bfloat16)
    w3b = w3p.astype(jnp.bfloat16)
    b1r = b1f.reshape(1, H1)
    b2r = b2f.reshape(1, H2)
    b3r = b3p.reshape(1, D_OUT_PAD)

    weight_spec = lambda shape: pl.BlockSpec(shape, lambda i: (0, 0))

    flops = 2 * B_pad * (D_IN_PAD * H1 + H1 * H2 + H2 * D_OUT_PAD)
    bytes_accessed = (xp.size * 2 + w1b.size * 2 + w2b.size * 2 + w3b.size * 2
                      + (b1r.size + b2r.size + b3r.size) * 4
                      + B_pad * D_OUT_PAD * 4)

    out_pad = pl.pallas_call(
        mlp_kernel,
        out_shape=jax.ShapeDtypeStruct((B_pad, D_OUT_PAD), jnp.float32),
        grid=(B_pad // TB,),
        in_specs=[
            pl.BlockSpec((TB, D_IN_PAD), lambda i: (i, 0)),   # x: batch-tiled
            weight_spec((D_IN_PAD, H1)),                      # weights resident
            weight_spec((1, H1)),
            weight_spec((H1, H2)),
            weight_spec((1, H2)),
            weight_spec((H2, D_OUT_PAD)),
            weight_spec((1, D_OUT_PAD)),
        ],
        out_specs=pl.BlockSpec((TB, D_OUT_PAD), lambda i: (i, 0)),
        compiler_params=pltpu.CompilerParams(
            dimension_semantics=("parallel",)),
        cost_estimate=pl.CostEstimate(
            flops=flops,
            transcendentals=B_pad * (D_OUT_PAD + 1),
            bytes_accessed=bytes_accessed),
    )(xp, w1b, b1r, w2b, b2r, w3b, b3r)

    return out_pad[:B, :D_OUT]


def init_params(key):
    """Deterministic parameter init matching the module's shapes."""
    ks = jax.random.split(key, 8)

    def linear(kw, kb, fan_in, fan_out):
        bound = 1.0 / jnp.sqrt(fan_in)
        w = jax.random.uniform(kw, (fan_in, fan_out), jnp.float32, -bound, bound)
        b = jax.random.uniform(kb, (fan_out,), jnp.float32, -bound, bound)
        return w, b

    w1, b1 = linear(ks[0], ks[1], D_IN, H1)
    w2, b2 = linear(ks[2], ks[3], H1, H2)
    w3, b3 = linear(ks[4], ks[5], H2, D_OUT)

    # BatchNorm1d params: gamma, beta, running_mean, running_var.
    g1 = 1.0 + 0.1 * jax.random.normal(ks[6], (H1,), jnp.float32)
    be1 = 0.05 * jax.random.normal(ks[7], (H1,), jnp.float32)
    m1 = jnp.zeros((H1,), jnp.float32)
    v1 = jnp.ones((H1,), jnp.float32)

    g2 = jnp.ones((H2,), jnp.float32)
    be2 = jnp.zeros((H2,), jnp.float32)
    m2 = jnp.zeros((H2,), jnp.float32)
    v2 = jnp.ones((H2,), jnp.float32)

    return (w1, b1, g1, be1, m1, v1,
            w2, b2, g2, be2, m2, v2,
            w3, b3)


if __name__ == "__main__":
    key = jax.random.PRNGKey(0)
    kx, kp = jax.random.split(key)

    B = 8
    x = jax.random.normal(kx, (B, 1, 28, 28), jnp.float32)            # NCHW input
    params = init_params(kp)

    out = jax.jit(net_forward)(x, params)
    out = jax.block_until_ready(out)

    assert out.shape == (B, D_OUT)
    # log_softmax rows must (log-)sum to ~1.
    assert jnp.allclose(jnp.sum(jnp.exp(out), axis=1), 1.0, atol=1e-4)
    print("KERNEL_OK")
</pallas_src>

<mosaic_0001>
module attributes {stable_mosaic.version = 11 : i64} {
  func.func @mlp_kernel(%arg0: i32, %arg1: memref<8x896xbf16, #tpu.memory_space<vmem>>, %arg2: memref<896x512xbf16, #tpu.memory_space<vmem>>, %arg3: memref<1x512xf32, #tpu.memory_space<vmem>>, %arg4: memref<512x256xbf16, #tpu.memory_space<vmem>>, %arg5: memref<1x256xf32, #tpu.memory_space<vmem>>, %arg6: memref<256x128xbf16, #tpu.memory_space<vmem>>, %arg7: memref<1x128xf32, #tpu.memory_space<vmem>>, %arg8: memref<8x128xf32, #tpu.memory_space<vmem>>) attributes {dimension_semantics = [#tpu.dimension_semantics<parallel>], iteration_bounds = array<i64: 1>, scalar_prefetch = 0 : i64, scratch_operands = 0 : i64, tpu.core_type = #tpu.core_type<tc>, window_params = [{transform_indices = @transform_0, window_bounds = array<i64: 8, 896>}, {pipeline_mode = #tpu.pipeline_mode<synchronous>, transform_indices = @transform_1, window_bounds = array<i64: 896, 512>}, {pipeline_mode = #tpu.pipeline_mode<synchronous>, transform_indices = @transform_2, window_bounds = array<i64: 1, 512>}, {pipeline_mode = #tpu.pipeline_mode<synchronous>, transform_indices = @transform_3, window_bounds = array<i64: 512, 256>}, {pipeline_mode = #tpu.pipeline_mode<synchronous>, transform_indices = @transform_4, window_bounds = array<i64: 1, 256>}, {pipeline_mode = #tpu.pipeline_mode<synchronous>, transform_indices = @transform_5, window_bounds = array<i64: 256, 128>}, {pipeline_mode = #tpu.pipeline_mode<synchronous>, transform_indices = @transform_6, window_bounds = array<i64: 1, 128>}, {transform_indices = @transform_7, window_bounds = array<i64: 8, 128>}]} {
    %c0 = arith.constant 0 : index
    %c0_0 = arith.constant 0 : index
    %0 = vector.load %arg1[%c0, %c0_0] : memref<8x896xbf16, #tpu.memory_space<vmem>>, vector<8x896xbf16>
    %c0_1 = arith.constant 0 : index
    %c0_2 = arith.constant 0 : index
    %1 = vector.load %arg2[%c0_1, %c0_2] : memref<896x512xbf16, #tpu.memory_space<vmem>>, vector<896x512xbf16>
    %cst = arith.constant dense<0.000000e+00> : vector<8x512xf32>
    %2 = tpu.matmul %0, %1, %cst {dimension_numbers = #tpu.dot_dimension_numbers<[1], [0], [0], [1], [0, 0, 1, 1], [], []>} : vector<8x896xbf16>, vector<896x512xbf16>, vector<8x512xf32> -> vector<8x512xf32>
    %c0_3 = arith.constant 0 : index
    %c0_4 = arith.constant 0 : index
    %3 = vector.load %arg3[%c0_3, %c0_4] : memref<1x512xf32, #tpu.memory_space<vmem>>, vector<1x512xf32>
    %4 = vector.broadcast %3 : vector<1x512xf32> to vector<8x512xf32>
    %5 = arith.addf %2, %4 : vector<8x512xf32>
    %cst_5 = arith.constant 0.000000e+00 : f32
    %6 = vector.broadcast %cst_5 : f32 to vector<8x512xf32>
    %7 = arith.maximumf %5, %6 : vector<8x512xf32>
    %8 = arith.truncf %7 : vector<8x512xf32> to vector<8x512xbf16>
    %c0_6 = arith.constant 0 : index
    %c0_7 = arith.constant 0 : index
    %9 = vector.load %arg4[%c0_6, %c0_7] : memref<512x256xbf16, #tpu.memory_space<vmem>>, vector<512x256xbf16>
    %cst_8 = arith.constant dense<0.000000e+00> : vector<8x256xf32>
    %10 = tpu.matmul %8, %9, %cst_8 {dimension_numbers = #tpu.dot_dimension_numbers<[1], [0], [0], [1], [0, 0, 1, 1], [], []>} : vector<8x512xbf16>, vector<512x256xbf16>, vector<8x256xf32> -> vector<8x256xf32>
    %c0_9 = arith.constant 0 : index
    %c0_10 = arith.constant 0 : index
    %11 = vector.load %arg5[%c0_9, %c0_10] : memref<1x256xf32, #tpu.memory_space<vmem>>, vector<1x256xf32>
    %12 = vector.broadcast %11 : vector<1x256xf32> to vector<8x256xf32>
    %13 = arith.addf %10, %12 : vector<8x256xf32>
    %cst_11 = arith.constant 0.000000e+00 : f32
    %14 = vector.broadcast %cst_11 : f32 to vector<8x256xf32>
    %15 = arith.maximumf %13, %14 : vector<8x256xf32>
    %16 = arith.truncf %15 : vector<8x256xf32> to vector<8x256xbf16>
    %c0_12 = arith.constant 0 : index
    %c0_13 = arith.constant 0 : index
    %17 = vector.load %arg6[%c0_12, %c0_13] : memref<256x128xbf16, #tpu.memory_space<vmem>>, vector<256x128xbf16>
    %cst_14 = arith.constant dense<0.000000e+00> : vector<8x128xf32>
    %18 = tpu.matmul %16, %17, %cst_14 {dimension_numbers = #tpu.dot_dimension_numbers<[1], [0], [0], [1], [0, 0, 1, 1], [], []>} : vector<8x256xbf16>, vector<256x128xbf16>, vector<8x128xf32> -> vector<8x128xf32>
    %c0_15 = arith.constant 0 : index
    %c0_16 = arith.constant 0 : index
    %19 = vector.load %arg7[%c0_15, %c0_16] : memref<1x128xf32, #tpu.memory_space<vmem>>, vector<1x128xf32>
    %20 = vector.broadcast %19 : vector<1x128xf32> to vector<8x128xf32>
    %21 = arith.addf %18, %20 : vector<8x128xf32>
    %cst_17 = arith.constant dense<0xFF800000> : vector<8xf32>
    %22 = vector.multi_reduction <maximumf>, %21, %cst_17 [1] : vector<8x128xf32> to vector<8xf32>
    %23 = vector.shape_cast %22 : vector<8xf32> to vector<8x1xf32>
    %24 = vector.broadcast %23 : vector<8x1xf32> to vector<8x128xf32>
    %25 = arith.subf %21, %24 : vector<8x128xf32>
    %26 = math.exp %25 : vector<8x128xf32>
    %cst_18 = arith.constant dense<0.000000e+00> : vector<8xf32>
    %27 = vector.multi_reduction <add>, %26, %cst_18 [1] : vector<8x128xf32> to vector<8xf32>
    %28 = vector.shape_cast %27 : vector<8xf32> to vector<8x1xf32>
    %29 = math.log %28 : vector<8x1xf32>
    %30 = arith.addf %29, %23 : vector<8x1xf32>
    %31 = vector.broadcast %30 : vector<8x1xf32> to vector<8x128xf32>
    %32 = arith.subf %21, %31 : vector<8x128xf32>
    %c0_19 = arith.constant 0 : index
    %c0_20 = arith.constant 0 : index
    %33 = vector.load %arg8[%c0_19, %c0_20] : memref<8x128xf32, #tpu.memory_space<vmem>>, vector<8x128xf32>
    tpu.vector_store %arg8[%c0_19, %c0_20], %32 {strides = array<i32>} : memref<8x128xf32, #tpu.memory_space<vmem>>, vector<8x128xf32>,
    return
  }
  func.func @transform_0(%arg0: i32) -> (i32, i32) {
    %c0_i32 = arith.constant 0 : i32
    %c0_i32_0 = arith.constant 0 : i32
    return %arg0, %c0_i32 : i32, i32
  }
  func.func @transform_1(%arg0: i32) -> (i32, i32) {
    %c0_i32 = arith.constant 0 : i32
    %c0_i32_0 = arith.constant 0 : i32
    %c0_i32_1 = arith.constant 0 : i32
    return %c0_i32, %c0_i32_0 : i32, i32
  }
  func.func @transform_2(%arg0: i32) -> (i32, i32) {
    %c0_i32 = arith.constant 0 : i32
    %c0_i32_0 = arith.constant 0 : i32
    %c0_i32_1 = arith.constant 0 : i32
    return %c0_i32, %c0_i32_0 : i32, i32
  }
  func.func @transform_3(%arg0: i32) -> (i32, i32) {
    %c0_i32 = arith.constant 0 : i32
    %c0_i32_0 = arith.constant 0 : i32
    %c0_i32_1 = arith.constant 0 : i32
    return %c0_i32, %c0_i32_0 : i32, i32
  }
  func.func @transform_4(%arg0: i32) -> (i32, i32) {
    %c0_i32 = arith.constant 0 : i32
    %c0_i32_0 = arith.constant 0 : i32
    %c0_i32_1 = arith.constant 0 : i32
    return %c0_i32, %c0_i32_0 : i32, i32
  }
  func.func @transform_5(%arg0: i32) -> (i32, i32) {
    %c0_i32 = arith.constant 0 : i32
    %c0_i32_0 = arith.constant 0 : i32
    %c0_i32_1 = arith.constant 0 : i32
    return %c0_i32, %c0_i32_0 : i32, i32
  }
  func.func @transform_6(%arg0: i32) -> (i32, i32) {
    %c0_i32 = arith.constant 0 : i32
    %c0_i32_0 = arith.constant 0 : i32
    %c0_i32_1 = arith.constant 0 : i32
    return %c0_i32, %c0_i32_0 : i32, i32
  }
  func.func @transform_7(%arg0: i32) -> (i32, i32) {
    %c0_i32 = arith.constant 0 : i32
    %c0_i32_0 = arith.constant 0 : i32
    return %arg0, %c0_i32 : i32, i32
  }
}

</mosaic_0001>

<bundles_post_ra>
// kernel: net_forward.1
= control target key start
LH: loop header
LB: loop body
LE: loop exit
PB: predicated region body
PF: predicated region fallthrough
CT: control target
= control target key end

     0   :  { %s4336_s0 = inlined_call_operand.vmem [shape: bf16[8,896], index: 0, kind: input, shape index: {}]   ;;  %s4337_s1 = inlined_call_operand.vmem [shape: bf16[896,512], index: 1, kind: input, shape index: {}]   ;;  %s4338_s2 = inlined_call_operand.vmem [shape: f32[1,512], index: 2, kind: input, shape index: {}]   ;;  %s4339_s3 = inlined_call_operand.vmem [shape: bf16[512,256], index: 3, kind: input, shape index: {}]   ;;  %s4340_s4 = inlined_call_operand.vmem [shape: f32[1,256], index: 4, kind: input, shape index: {}]   ;;  %s4341_s5 = inlined_call_operand.vmem [shape: bf16[256,128], index: 5, kind: input, shape index: {}]   ;;  %s4342_s6 = inlined_call_operand.vmem [shape: f32[1,128], index: 6, kind: input, shape index: {}]   ;;  %s4343_s7 = inlined_call_operand.hbm [shape: f32[8,128], index: 7, kind: output, shape index: {}]  }
   0x1   :  { %v2810_v0 = vld [vmem:[%s4337_s1 + $0x4] ss:$16 sps:$4 sm:$0xff]   ;;  %v2814_v2 = vld [vmem:[%s4337_s1] ss:$16 sps:$4 sm:$0xff]   ;;  %v29_v48 = vld [vmem:[%s4336_s0 + $0x8] sm:$0xff] }
   0x2   :  { %v2812_v1 = vld [vmem:[%s4337_s1 + $0x204] ss:$16 sps:$4 sm:$0xff]   ;;  %1423 = vmatprep.subr.bf16.mxu1 %v2810_v0  ;;  %v2815_v3 = vld [vmem:[%s4337_s1 + $0x200] ss:$16 sps:$4 sm:$0xff]   ;;  %v3487_v51 = vcombine.high %v29_v48, %v29_v48 }
   0x3   :  { %1464 = vmatprep.subr.bf16.mxu0 %v2812_v1  ;;  %v2816_v4 = vld [vmem:[%s4337_s1 + $0x24] ss:$16 sps:$4 sm:$0xff]   ;;  %1424 = vmatpush1.bf16.msra.mxu1 %v2814_v2  ;;  %v2820_v6 = vld [vmem:[%s4337_s1 + $0x20] ss:$16 sps:$4 sm:$0xff]  }
   0x4   :  { %1465 = vmatpush1.bf16.msra.mxu0 %v2815_v3  ;;  %v2818_v5 = vld [vmem:[%s4337_s1 + $0x224] ss:$16 sps:$4 sm:$0xff]   ;;  %1425 = vmatprep.subr.bf16.mxu1 %v2816_v4  ;;  %v2821_v7 = vld [vmem:[%s4337_s1 + $0x220] ss:$16 sps:$4 sm:$0xff]  }
   0x5   :  { %1466 = vmatprep.subr.bf16.mxu0 %v2818_v5  ;;  %v2822_v8 = vld [vmem:[%s4337_s1 + $0x44] ss:$16 sps:$4 sm:$0xff]   ;;  %v2826_v10 = vld [vmem:[%s4337_s1 + $0x40] ss:$16 sps:$4 sm:$0xff]   ;;  %1496 = vmatprep.mubr.bf16.mxu0 %v3487_v51  ;;  %v2915_v5 = vld [vmem:[%s4337_s1 + $0xc] ss:$16 sps:$4 sm:$0xff]  }
   0x6   :  { %v2824_v9 = vld [vmem:[%s4337_s1 + $0x244] ss:$16 sps:$4 sm:$0xff]   ;;  %v2827_v11 = vld [vmem:[%s4337_s1 + $0x240] ss:$16 sps:$4 sm:$0xff]  }
   0x7   :  { %1426 = vmatpush1.bf16.msra.mxu1 %v2820_v6  ;;  %v2828_v12 = vld [vmem:[%s4337_s1 + $0x64] ss:$16 sps:$4 sm:$0xff]   ;;  %v2832_v14 = vld [vmem:[%s4337_s1 + $0x60] ss:$16 sps:$4 sm:$0xff]  }
   0x8   :  { %1467 = vmatpush1.bf16.msra.mxu0 %v2821_v7  ;;  %1427 = vmatprep.subr.bf16.mxu1 %v2822_v8  ;;  %v2830_v13 = vld [vmem:[%s4337_s1 + $0x264] ss:$16 sps:$4 sm:$0xff]   ;;  %v2833_v15 = vld [vmem:[%s4337_s1 + $0x260] ss:$16 sps:$4 sm:$0xff]   ;;  %v3547_v7 = vcombine.low %v29_v48, %v29_v48 }
   0x9   :  { %1468 = vmatprep.subr.bf16.mxu0 %v2824_v9  ;;  %v2834_v16 = vld [vmem:[%s4337_s1 + $0x84] ss:$16 sps:$4 sm:$0xff]   ;;  %v2838_v18 = vld [vmem:[%s4337_s1 + $0x80] ss:$16 sps:$4 sm:$0xff]   ;;  %v2913_v9 = vld [vmem:[%s4337_s1 + $0x8] ss:$16 sps:$4 sm:$0xff]  }
   0xa   :  { %v2836_v17 = vld [vmem:[%s4337_s1 + $0x284] ss:$16 sps:$4 sm:$0xff]   ;;  %v2839_v19 = vld [vmem:[%s4337_s1 + $0x280] ss:$16 sps:$4 sm:$0xff]  }
   0xb   :  { %1428 = vmatpush1.bf16.msra.mxu1 %v2826_v10  ;;  %v2840_v20 = vld [vmem:[%s4337_s1 + $0xa4] ss:$16 sps:$4 sm:$0xff]   ;;  %v2844_v22 = vld [vmem:[%s4337_s1 + $0xa0] ss:$16 sps:$4 sm:$0xff]  }
   0xc   :  { %1469 = vmatpush1.bf16.msra.mxu0 %v2827_v11  ;;  %1429 = vmatprep.subr.bf16.mxu1 %v2828_v12  ;;  %v2842_v21 = vld [vmem:[%s4337_s1 + $0x2a4] ss:$16 sps:$4 sm:$0xff]   ;;  %v2845_v23 = vld [vmem:[%s4337_s1 + $0x2a0] ss:$16 sps:$4 sm:$0xff]   ;;  %v2921_v11 = vld [vmem:[%s4337_s1 + $0x2c] ss:$16 sps:$4 sm:$0xff]  }
   0xd   :  { %1470 = vmatprep.subr.bf16.mxu0 %v2830_v13  ;;  %v2846_v24 = vld [vmem:[%s4337_s1 + $0xc4] ss:$16 sps:$4 sm:$0xff]   ;;  %v2850_v26 = vld [vmem:[%s4337_s1 + $0xc0] ss:$16 sps:$4 sm:$0xff]   ;;  %v2919_v13 = vld [vmem:[%s4337_s1 + $0x28] ss:$16 sps:$4 sm:$0xff]  }
   0xe   :  { %v2848_v25 = vld [vmem:[%s4337_s1 + $0x2c4] ss:$16 sps:$4 sm:$0xff]   ;;  %v2851_v27 = vld [vmem:[%s4337_s1 + $0x2c0] ss:$16 sps:$4 sm:$0xff]  }
   0xf   :  { %1430 = vmatpush1.bf16.msra.mxu1 %v2832_v14  ;;  %v2852_v28 = vld [vmem:[%s4337_s1 + $0xe4] ss:$16 sps:$4 sm:$0xff]   ;;  %v2856_v30 = vld [vmem:[%s4337_s1 + $0xe0] ss:$16 sps:$4 sm:$0xff]  }
  0x10   :  { %1471 = vmatpush1.bf16.msra.mxu0 %v2833_v15  ;;  %1431 = vmatprep.subr.bf16.mxu1 %v2834_v16  ;;  %v2854_v29 = vld [vmem:[%s4337_s1 + $0x2e4] ss:$16 sps:$4 sm:$0xff]   ;;  %v2857_v31 = vld [vmem:[%s4337_s1 + $0x2e0] ss:$16 sps:$4 sm:$0xff]   ;;  %v2927_v15 = vld [vmem:[%s4337_s1 + $0x4c] ss:$16 sps:$4 sm:$0xff]  }
  0x11   :  { %1472 = vmatprep.subr.bf16.mxu0 %v2836_v17  ;;  %v2858_v32 = vld [vmem:[%s4337_s1 + $0x104] ss:$16 sps:$4 sm:$0xff]   ;;  %v2862_v34 = vld [vmem:[%s4337_s1 + $0x100] ss:$16 sps:$4 sm:$0xff]   ;;  %v2925_v17 = vld [vmem:[%s4337_s1 + $0x48] ss:$16 sps:$4 sm:$0xff]  }
  0x12   :  { %v2860_v33 = vld [vmem:[%s4337_s1 + $0x304] ss:$16 sps:$4 sm:$0xff]   ;;  %v2863_v35 = vld [vmem:[%s4337_s1 + $0x300] ss:$16 sps:$4 sm:$0xff]  }
  0x13   :  { %1432 = vmatpush1.bf16.msra.mxu1 %v2838_v18  ;;  %v2864_v36 = vld [vmem:[%s4337_s1 + $0x124] ss:$16 sps:$4 sm:$0xff]   ;;  %v2868_v38 = vld [vmem:[%s4337_s1 + $0x120] ss:$16 sps:$4 sm:$0xff]  }
  0x14   :  { %1473 = vmatpush1.bf16.msra.mxu0 %v2839_v19  ;;  %1433 = vmatprep.subr.bf16.mxu1 %v2840_v20  ;;  %v2866_v37 = vld [vmem:[%s4337_s1 + $0x324] ss:$16 sps:$4 sm:$0xff]   ;;  %v2869_v39 = vld [vmem:[%s4337_s1 + $0x320] ss:$16 sps:$4 sm:$0xff]   ;;  %v2933_v19 = vld [vmem:[%s4337_s1 + $0x6c] ss:$16 sps:$4 sm:$0xff]  }
  0x15   :  { %1474 = vmatprep.subr.bf16.mxu0 %v2842_v21  ;;  %v2870_v40 = vld [vmem:[%s4337_s1 + $0x144] ss:$16 sps:$4 sm:$0xff]   ;;  %v2874_v42 = vld [vmem:[%s4337_s1 + $0x140] ss:$16 sps:$4 sm:$0xff]   ;;  %v2931_v21 = vld [vmem:[%s4337_s1 + $0x68] ss:$16 sps:$4 sm:$0xff]  }
  0x16   :  { %v2872_v41 = vld [vmem:[%s4337_s1 + $0x344] ss:$16 sps:$4 sm:$0xff]   ;;  %v2875_v43 = vld [vmem:[%s4337_s1 + $0x340] ss:$16 sps:$4 sm:$0xff]  }
  0x17   :  { %1434 = vmatpush1.bf16.msra.mxu1 %v2844_v22  ;;  %v2876_v44 = vld [vmem:[%s4337_s1 + $0x164] ss:$16 sps:$4 sm:$0xff]   ;;  %v2880_v49 = vld [vmem:[%s4337_s1 + $0x160] ss:$16 sps:$4 sm:$0xff]  }
  0x18   :  { %1475 = vmatpush1.bf16.msra.mxu0 %v2845_v23  ;;  %1435 = vmatprep.subr.bf16.mxu1 %v2846_v24  ;;  %v2878_v45 = vld [vmem:[%s4337_s1 + $0x364] ss:$16 sps:$4 sm:$0xff]   ;;  %v2881_v50 = vld [vmem:[%s4337_s1 + $0x360] ss:$16 sps:$4 sm:$0xff]   ;;  %v2939_v23 = vld [vmem:[%s4337_s1 + $0x8c] ss:$16 sps:$4 sm:$0xff]  }
  0x19   :  { %1476 = vmatprep.subr.bf16.mxu0 %v2848_v25  ;;  %v28_v46 = vld [vmem:[%s4336_s0] sm:$0xff]  ;;  %v2937_v25 = vld [vmem:[%s4337_s1 + $0x88] ss:$16 sps:$4 sm:$0xff]  }
  0x1a   :  { %v3476_v47 = vcombine.high %v28_v46, %v28_v46  ;;  %v2882_v52 = vld [vmem:[%s4337_s1 + $0x184] ss:$16 sps:$4 sm:$0xff]   ;;  %v2886_v54 = vld [vmem:[%s4337_s1 + $0x180] ss:$16 sps:$4 sm:$0xff]   ;;  %v3545_v6 = vcombine.low %v28_v46, %v28_v46 }
  0x1b   :  { %1436 = vmatpush1.bf16.msra.mxu1 %v2850_v26  ;;  %v2884_v53 = vld [vmem:[%s4337_s1 + $0x384] ss:$16 sps:$4 sm:$0xff]   ;;  %v2887_v55 = vld [vmem:[%s4337_s1 + $0x380] ss:$16 sps:$4 sm:$0xff]  }
  0x1c   :  { %1477 = vmatpush1.bf16.msra.mxu0 %v2851_v27  ;;  %1437 = vmatprep.subr.bf16.mxu1 %v2852_v28  ;;  %v2888_v56 = vld [vmem:[%s4337_s1 + $0x1a4] ss:$16 sps:$4 sm:$0xff]   ;;  %v2892_v58 = vld [vmem:[%s4337_s1 + $0x1a0] ss:$16 sps:$4 sm:$0xff]   ;;  %v2945_v27 = vld [vmem:[%s4337_s1 + $0xac] ss:$16 sps:$4 sm:$0xff]  }
  0x1d   :  { %1478 = vmatprep.subr.bf16.mxu0 %v2854_v29  ;;  %1455 = vmatprep.mubr.bf16.mxu1 %v3476_v47  ;;  %v2890_v57 = vld [vmem:[%s4337_s1 + $0x3a4] ss:$16 sps:$4 sm:$0xff]   ;;  %v2893_v59 = vld [vmem:[%s4337_s1 + $0x3a0] ss:$16 sps:$4 sm:$0xff]   ;;  %v2943_v29 = vld [vmem:[%s4337_s1 + $0xa8] ss:$16 sps:$4 sm:$0xff]  }
  0x1e   :  { %v2894_v60 = vld [vmem:[%s4337_s1 + $0x1c4] ss:$16 sps:$4 sm:$0xff]   ;;  %v2898_v62 = vld [vmem:[%s4337_s1 + $0x1c0] ss:$16 sps:$4 sm:$0xff]  }
  0x1f   :  { %1438 = vmatpush1.bf16.msra.mxu1 %v2856_v30  ;;  %v2896_v61 = vld [vmem:[%s4337_s1 + $0x3c4] ss:$16 sps:$4 sm:$0xff]   ;;  %v2899_v63 = vld [vmem:[%s4337_s1 + $0x3c0] ss:$16 sps:$4 sm:$0xff]  }
  0x20   :  { %1479 = vmatpush1.bf16.msra.mxu0 %v2857_v31  ;;  %1439 = vmatprep.subr.bf16.mxu1 %v2858_v32  ;;  %v2900_v0 = vld [vmem:[%s4337_s1 + $0x1e4] ss:$16 sps:$4 sm:$0xff]   ;;  %v2904_v2 = vld [vmem:[%s4337_s1 + $0x1e0] ss:$16 sps:$4 sm:$0xff]   ;;  %v2951_v31 = vld [vmem:[%s4337_s1 + $0xcc] ss:$16 sps:$4 sm:$0xff]  }
  0x21   :  { %1480 = vmatprep.subr.bf16.mxu0 %v2860_v33  ;;  %v2902_v1 = vld [vmem:[%s4337_s1 + $0x3e4] ss:$16 sps:$4 sm:$0xff]   ;;  %v2905_v3 = vld [vmem:[%s4337_s1 + $0x3e0] ss:$16 sps:$4 sm:$0xff]  }
  0x22   :  { %v2912_v4 = vld [vmem:[%s4337_s1 + $0x404] ss:$16 sps:$4 sm:$0xff]   ;;  %v2910_v8 = vld [vmem:[%s4337_s1 + $0x400] ss:$16 sps:$4 sm:$0xff]  }
  0x23   :  { %1440 = vmatpush1.bf16.msra.mxu1 %v2862_v34  ;;  %v2918_v10 = vld [vmem:[%s4337_s1 + $0x424] ss:$16 sps:$4 sm:$0xff]   ;;  %v2916_v12 = vld [vmem:[%s4337_s1 + $0x420] ss:$16 sps:$4 sm:$0xff]  }
  0x24   :  { %1481 = vmatpush1.bf16.msra.mxu0 %v2863_v35  ;;  %1441 = vmatprep.subr.bf16.mxu1 %v2864_v36  ;;  %v2924_v14 = vld [vmem:[%s4337_s1 + $0x444] ss:$16 sps:$4 sm:$0xff]   ;;  %v2922_v16 = vld [vmem:[%s4337_s1 + $0x440] ss:$16 sps:$4 sm:$0xff]   ;;  %v2949_v35 = vld [vmem:[%s4337_s1 + $0xc8] ss:$16 sps:$4 sm:$0xff]  }
  0x25   :  { %1482 = vmatprep.subr.bf16.mxu0 %v2866_v37  ;;  %v2930_v18 = vld [vmem:[%s4337_s1 + $0x464] ss:$16 sps:$4 sm:$0xff]   ;;  %v2928_v20 = vld [vmem:[%s4337_s1 + $0x460] ss:$16 sps:$4 sm:$0xff]   ;;  %v2957_v37 = vld [vmem:[%s4337_s1 + $0xec] ss:$16 sps:$4 sm:$0xff]  }
  0x26   :  { %v2936_v22 = vld [vmem:[%s4337_s1 + $0x484] ss:$16 sps:$4 sm:$0xff]   ;;  %v2934_v24 = vld [vmem:[%s4337_s1 + $0x480] ss:$16 sps:$4 sm:$0xff]  }
  0x27   :  { %1442 = vmatpush1.bf16.msra.mxu1 %v2868_v38  ;;  %v2942_v26 = vld [vmem:[%s4337_s1 + $0x4a4] ss:$16 sps:$4 sm:$0xff]   ;;  %v2940_v28 = vld [vmem:[%s4337_s1 + $0x4a0] ss:$16 sps:$4 sm:$0xff]  }
  0x28   :  { %1483 = vmatpush1.bf16.msra.mxu0 %v2869_v39  ;;  %1443 = vmatprep.subr.bf16.mxu1 %v2870_v40  ;;  %v2948_v30 = vld [vmem:[%s4337_s1 + $0x4c4] ss:$16 sps:$4 sm:$0xff]   ;;  %v2946_v33 = vld [vmem:[%s4337_s1 + $0x4c0] ss:$16 sps:$4 sm:$0xff]   ;;  %v2955_v39 = vld [vmem:[%s4337_s1 + $0xe8] ss:$16 sps:$4 sm:$0xff]  }
  0x29   :  { %1484 = vmatprep.subr.bf16.mxu0 %v2872_v41  ;;  %v3627_v32 = vld [vmem:[%s4336_s0 + $0x10] sm:$0xff]  ;;  %v2963_v41 = vld [vmem:[%s4337_s1 + $0x10c] ss:$16 sps:$4 sm:$0xff]  }
  0x2a   :  { %v3634_v34 = vcombine.high %v3627_v32, %v3627_v32  ;;  %v2954_v36 = vld [vmem:[%s4337_s1 + $0x4e4] ss:$16 sps:$4 sm:$0xff]   ;;  %v2952_v38 = vld [vmem:[%s4337_s1 + $0x4e0] ss:$16 sps:$4 sm:$0xff]  }
  0x2b   :  { %1444 = vmatpush1.bf16.msra.mxu1 %v2874_v42  ;;  %v2960_v40 = vld [vmem:[%s4337_s1 + $0x504] ss:$16 sps:$4 sm:$0xff]   ;;  %v2958_v42 = vld [vmem:[%s4337_s1 + $0x500] ss:$16 sps:$4 sm:$0xff]  }
  0x2c   :  { %1485 = vmatpush1.bf16.msra.mxu0 %v2875_v43  ;;  %1445 = vmatprep.subr.bf16.mxu1 %v2876_v44  ;;  %v2961_v43 = vld [vmem:[%s4337_s1 + $0x108] ss:$16 sps:$4 sm:$0xff]   ;;  %v2966_v44 = vld [vmem:[%s4337_s1 + $0x524] ss:$16 sps:$4 sm:$0xff]   ;;  %v2964_v46 = vld [vmem:[%s4337_s1 + $0x520] ss:$16 sps:$4 sm:$0xff]  }
  0x2d   :  { %1486 = vmatprep.subr.bf16.mxu0 %v2878_v45  ;;  %v2969_v45 = vld [vmem:[%s4337_s1 + $0x12c] ss:$16 sps:$4 sm:$0xff]   ;;  %v2972_v48 = vld [vmem:[%s4337_s1 + $0x544] ss:$16 sps:$4 sm:$0xff]  }
  0x2f   :  { %1446 = vmatpush1.bf16.msra.mxu1 %v2880_v49  ;;  %v2975_v49 = vld [vmem:[%s4337_s1 + $0x14c] ss:$16 sps:$4 sm:$0xff]  }
  0x30   :  { %1487 = vmatpush1.bf16.msra.mxu0 %v2881_v50  ;;  %1447 = vmatprep.subr.bf16.mxu1 %v2882_v52  ;;  %v2970_v50 = vld [vmem:[%s4337_s1 + $0x540] ss:$16 sps:$4 sm:$0xff]   ;;  %v2973_v52 = vld [vmem:[%s4337_s1 + $0x148] ss:$16 sps:$4 sm:$0xff]  }
  0x31   :  { %1488 = vmatprep.subr.bf16.mxu0 %v2884_v53  ;;  %v2978_v53 = vld [vmem:[%s4337_s1 + $0x564] ss:$16 sps:$4 sm:$0xff]  }
  0x33   :  { %1448 = vmatpush1.bf16.msra.mxu1 %v2886_v54  ;;  %v2981_v54 = vld [vmem:[%s4337_s1 + $0x16c] ss:$16 sps:$4 sm:$0xff]  }
  0x34   :  { %1489 = vmatpush1.bf16.msra.mxu0 %v2887_v55  ;;  %1449 = vmatprep.subr.bf16.mxu1 %v2888_v56  ;;  %v2976_v55 = vld [vmem:[%s4337_s1 + $0x560] ss:$16 sps:$4 sm:$0xff]   ;;  %v2979_v56 = vld [vmem:[%s4337_s1 + $0x168] ss:$16 sps:$4 sm:$0xff]  }
  0x35   :  { %1490 = vmatprep.subr.bf16.mxu0 %v2890_v57  ;;  %v2984_v57 = vld [vmem:[%s4337_s1 + $0x584] ss:$16 sps:$4 sm:$0xff]  }
  0x37   :  { %1450 = vmatpush1.bf16.msra.mxu1 %v2892_v58  ;;  %v2987_v58 = vld [vmem:[%s4337_s1 + $0x18c] ss:$16 sps:$4 sm:$0xff]  }
  0x38   :  { %1491 = vmatpush1.bf16.msra.mxu0 %v2893_v59  ;;  %1451 = vmatprep.subr.bf16.mxu1 %v2894_v60  ;;  %v2982_v59 = vld [vmem:[%s4337_s1 + $0x580] ss:$16 sps:$4 sm:$0xff]   ;;  %v2985_v60 = vld [vmem:[%s4337_s1 + $0x188] ss:$16 sps:$4 sm:$0xff]  }
  0x39   :  { %1492 = vmatprep.subr.bf16.mxu0 %v2896_v61  ;;  %v2990_v61 = vld [vmem:[%s4337_s1 + $0x5a4] ss:$16 sps:$4 sm:$0xff]  }
  0x3b   :  { %1452 = vmatpush1.bf16.msra.mxu1 %v2898_v62  ;;  %v2993_v62 = vld [vmem:[%s4337_s1 + $0x1ac] ss:$16 sps:$4 sm:$0xff]  }
  0x3c   :  { %1493 = vmatpush1.bf16.msra.mxu0 %v2899_v63  ;;  %1453 = vmatprep.subr.bf16.mxu1 %v2900_v0  ;;  %v2988_v63 = vld [vmem:[%s4337_s1 + $0x5a0] ss:$16 sps:$4 sm:$0xff]   ;;  %v2991_v0 = vld [vmem:[%s4337_s1 + $0x1a8] ss:$16 sps:$4 sm:$0xff]  }
  0x3d   :  { %1494 = vmatprep.subr.bf16.mxu0 %v2902_v1  ;;  %v2996_v1 = vld [vmem:[%s4337_s1 + $0x5c4] ss:$16 sps:$4 sm:$0xff]  }
  0x3f   :  { %1454 = vmatpush1.bf16.msra.mxu1 %v2904_v2  ;;  %v2999_v2 = vld [vmem:[%s4337_s1 + $0x1cc] ss:$16 sps:$4 sm:$0xff]  }
  0x40   :  { %1495 = vmatpush1.bf16.msra.mxu0 %v2905_v3  ;;  %1587 = vmatprep.subr.bf16.mxu1 %v2915_v5  ;;  %v2994_v3 = vld [vmem:[%s4337_s1 + $0x5c0] ss:$16 sps:$4 sm:$0xff]   ;;  %v3002_v5 = vld [vmem:[%s4337_s1 + $0x5e4] ss:$16 sps:$4 sm:$0xff]  }
  0x41   :  { %1505 = vmatprep.subr.bf16.mxu0 %v2912_v4  ;;  %v2997_v4 = vld [vmem:[%s4337_s1 + $0x1c8] ss:$16 sps:$4 sm:$0xff]  }
  0x42   :  { %1456 = vmatmul.mubr.bf16.vlgmr.msra.gmra.mrb[0].mxu1 %v3545_v6 }
  0x43   :  { %1497 = vmatmul.mubr.bf16.vlgmr.msra.gmra.mrb[0].mxu0 %v3547_v7  ;;  %1588 = vmatpush1.bf16.msra.mxu1 %v2913_v9  ;;  %v3000_v9 = vld [vmem:[%s4337_s1 + $0x5e0] ss:$16 sps:$4 sm:$0xff]  }
  0x44   :  { %1506 = vmatpush1.bf16.msra.mxu0 %v2910_v8  ;;  %1589 = vmatprep.subr.bf16.mxu1 %v2921_v11  ;;  %v3005_v8 = vld [vmem:[%s4337_s1 + $0x1ec] ss:$16 sps:$4 sm:$0xff]   ;;  %v3010_v11 = vld [vmem:[%s4337_s1 + $0x604] ss:$16 sps:$4 sm:$0xff]  }
  0x45   :  { %1507 = vmatprep.subr.bf16.mxu0 %v2918_v10  ;;  %1619 = vmatprep.mubr.bf16.mxu1 %v3476_v47  ;;  %v2967_v47 = vld [vmem:[%s4337_s1 + $0x128] ss:$16 sps:$4 sm:$0xff]  }
  0x46   :  { %1537 = vmatprep.mubr.bf16.mxu0 %v3634_v34  ;;  %v3003_v10 = vld [vmem:[%s4337_s1 + $0x1e8] ss:$16 sps:$4 sm:$0xff]  }
  0x47   :  { %1590 = vmatpush1.bf16.msra.mxu1 %v2919_v13  ;;  %v3756_v13 = vcombine.low %v3627_v32, %v3627_v32  ;;  %v3043_v32 = vld [vmem:[%s4337_s1 + $0x2ac] ss:$16 sps:$4 sm:$0xff]  }
  0x48   :  { %1508 = vmatpush1.bf16.msra.mxu0 %v2916_v12  ;;  %1591 = vmatprep.subr.bf16.mxu1 %v2927_v15  ;;  %v3013_v12 = vld [vmem:[%s4337_s1 + $0x20c] ss:$16 sps:$4 sm:$0xff]   ;;  %v3011_v15 = vld [vmem:[%s4337_s1 + $0x208] ss:$16 sps:$4 sm:$0xff]  }
  0x49   :  { %1509 = vmatprep.subr.bf16.mxu0 %v2924_v14  ;;  %v3008_v14 = vld [vmem:[%s4337_s1 + $0x600] ss:$16 sps:$4 sm:$0xff]  }
  0x4b   :  { %1592 = vmatpush1.bf16.msra.mxu1 %v2925_v17  ;;  %v3019_v17 = vld [vmem:[%s4337_s1 + $0x22c] ss:$16 sps:$4 sm:$0xff]  }
  0x4c   :  { %1510 = vmatpush1.bf16.msra.mxu0 %v2922_v16  ;;  %1593 = vmatprep.subr.bf16.mxu1 %v2933_v19  ;;  %v3016_v16 = vld [vmem:[%s4337_s1 + $0x624] ss:$16 sps:$4 sm:$0xff]   ;;  %v3017_v19 = vld [vmem:[%s4337_s1 + $0x228] ss:$16 sps:$4 sm:$0xff]  }
  0x4d   :  { %1511 = vmatprep.subr.bf16.mxu0 %v2930_v18  ;;  %v3014_v18 = vld [vmem:[%s4337_s1 + $0x620] ss:$16 sps:$4 sm:$0xff]  }
  0x4f   :  { %1594 = vmatpush1.bf16.msra.mxu1 %v2931_v21  ;;  %v3293_v21 = vmov 0  }
  0x50   :  { %1512 = vmatpush1.bf16.msra.mxu0 %v2928_v20  ;;  %1595 = vmatprep.subr.bf16.mxu1 %v2939_v23  ;;  %v3022_v20 = vld [vmem:[%s4337_s1 + $0x644] ss:$16 sps:$4 sm:$0xff]   ;;  %v3023_v23 = vld [vmem:[%s4337_s1 + $0x248] ss:$16 sps:$4 sm:$0xff]  }
  0x51   :  { %1513 = vmatprep.subr.bf16.mxu0 %v2936_v22  ;;  %v3020_v22 = vld [vmem:[%s4337_s1 + $0x640] ss:$16 sps:$4 sm:$0xff]  }
  0x53   :  { %1596 = vmatpush1.bf16.msra.mxu1 %v2937_v25  ;;  %v3026_v25 = vld [vmem:[%s4337_s1 + $0x660] ss:$16 sps:$4 sm:$0xff]  }
  0x54   :  { %1514 = vmatpush1.bf16.msra.mxu0 %v2934_v24  ;;  %1597 = vmatprep.subr.bf16.mxu1 %v2945_v27  ;;  %v3028_v24 = vld [vmem:[%s4337_s1 + $0x664] ss:$16 sps:$4 sm:$0xff]  }
  0x55   :  { %1515 = vmatprep.subr.bf16.mxu0 %v2942_v26  ;;  %v3029_v26 = vld [vmem:[%s4337_s1 + $0x268] ss:$16 sps:$4 sm:$0xff]   ;;  %v3034_v27 = vld [vmem:[%s4337_s1 + $0x684] ss:$16 sps:$4 sm:$0xff]  }
  0x57   :  { %1598 = vmatpush1.bf16.msra.mxu1 %v2943_v29  ;;  %v3032_v29 = vld [vmem:[%s4337_s1 + $0x680] ss:$16 sps:$4 sm:$0xff]  }
  0x58   :  { %1516 = vmatpush1.bf16.msra.mxu0 %v2940_v28  ;;  %1599 = vmatprep.subr.bf16.mxu1 %v2951_v31  ;;  %v3037_v28 = vld [vmem:[%s4337_s1 + $0x28c] ss:$16 sps:$4 sm:$0xff]   ;;  %v3040_v31 = vld [vmem:[%s4337_s1 + $0x6a4] ss:$16 sps:$4 sm:$0xff]  }
  0x59   :  { %1517 = vmatprep.subr.bf16.mxu0 %v2948_v30  ;;  %v3035_v30 = vld [vmem:[%s4337_s1 + $0x288] ss:$16 sps:$4 sm:$0xff]  }
  0x5b   :  { %1600 = vmatpush1.bf16.msra.mxu1 %v2949_v35  ;;  %v3041_v35 = vld [vmem:[%s4337_s1 + $0x2a8] ss:$16 sps:$4 sm:$0xff]  }
  0x5c   :  { %1518 = vmatpush1.bf16.msra.mxu0 %v2946_v33  ;;  %1601 = vmatprep.subr.bf16.mxu1 %v2957_v37  ;;  %v3038_v33 = vld [vmem:[%s4337_s1 + $0x6a0] ss:$16 sps:$4 sm:$0xff]   ;;  %v3049_v37 = vld [vmem:[%s4337_s1 + $0x2cc] ss:$16 sps:$4 sm:$0xff]  }
  0x5d   :  { %1519 = vmatprep.subr.bf16.mxu0 %v2954_v36  ;;  %v3046_v36 = vld [vmem:[%s4337_s1 + $0x6c4] ss:$16 sps:$4 sm:$0xff]  }
  0x5f   :  { %1602 = vmatpush1.bf16.msra.mxu1 %v2955_v39  ;;  %v3047_v39 = vld [vmem:[%s4337_s1 + $0x2c8] ss:$16 sps:$4 sm:$0xff]  }
  0x60   :  { %1520 = vmatpush1.bf16.msra.mxu0 %v2952_v38  ;;  %1603 = vmatprep.subr.bf16.mxu1 %v2963_v41  ;;  %v3044_v38 = vld [vmem:[%s4337_s1 + $0x6c0] ss:$16 sps:$4 sm:$0xff]   ;;  %v3055_v41 = vld [vmem:[%s4337_s1 + $0x2ec] ss:$16 sps:$4 sm:$0xff]  }
  0x61   :  { %1521 = vmatprep.subr.bf16.mxu0 %v2960_v40  ;;  %v3052_v40 = vld [vmem:[%s4337_s1 + $0x6e4] ss:$16 sps:$4 sm:$0xff]  }
  0x63   :  { %1604 = vmatpush1.bf16.msra.mxu1 %v2961_v43  ;;  %v3053_v43 = vld [vmem:[%s4337_s1 + $0x2e8] ss:$16 sps:$4 sm:$0xff]  }
  0x64   :  { %1522 = vmatpush1.bf16.msra.mxu0 %v2958_v42  ;;  %1605 = vmatprep.subr.bf16.mxu1 %v2969_v45  ;;  %v3050_v42 = vld [vmem:[%s4337_s1 + $0x6e0] ss:$16 sps:$4 sm:$0xff]   ;;  %v3858_v45 = vld [vmem:[%s4336_s0 + $0x18] ss:$0 sps:$4 sm:$0xff]  }
  0x65   :  { %1523 = vmatprep.subr.bf16.mxu0 %v2966_v44  ;;  %v3059_v44 = vld [vmem:[%s4337_s1 + $0x30c] ss:$16 sps:$4 sm:$0xff]  }
  0x67   :  { %1606 = vmatpush1.bf16.msra.mxu1 %v2967_v47  ;;  %v3062_v47 = vld [vmem:[%s4337_s1 + $0x32c] ss:$16 sps:$4 sm:$0xff]  }
  0x68   :  { %1524 = vmatpush1.bf16.msra.mxu0 %v2964_v46  ;;  %1607 = vmatprep.subr.bf16.mxu1 %v2975_v49  ;;  %v3057_v46 = vld [vmem:[%s4337_s1 + $0x308] ss:$16 sps:$4 sm:$0xff]   ;;  %v3155_v49 = vld [vmem:[%s4339_s3 + $0x4] ss:$8 sps:$4 sm:$0xff]  }
  0x69   :  { %1525 = vmatprep.subr.bf16.mxu0 %v2972_v48  ;;  %v3153_v48 = vld [vmem:[%s4339_s3] ss:$8 sps:$4 sm:$0xff]  }
  0x6b   :  { %1608 = vmatpush1.bf16.msra.mxu1 %v2973_v52  ;;  %v3158_v52 = vld [vmem:[%s4339_s3 + $0x14] ss:$8 sps:$4 sm:$0xff]  }
  0x6c   :  { %1526 = vmatpush1.bf16.msra.mxu0 %v2970_v50  ;;  %1609 = vmatprep.subr.bf16.mxu1 %v2981_v54  ;;  %v3060_v50 = vld [vmem:[%s4337_s1 + $0x328] ss:$16 sps:$4 sm:$0xff]  }
  0x6d   :  { %1527 = vmatprep.subr.bf16.mxu0 %v2978_v53  ;;  %v3065_v53 = vld [vmem:[%s4337_s1 + $0x34c] ss:$16 sps:$4 sm:$0xff]   ;;  %v3156_v54 = vld [vmem:[%s4339_s3 + $0x10] ss:$8 sps:$4 sm:$0xff]  }
  0x6f   :  { %1610 = vmatpush1.bf16.msra.mxu1 %v2979_v56  ;;  %v3063_v56 = vld [vmem:[%s4337_s1 + $0x348] ss:$16 sps:$4 sm:$0xff]  }
  0x70   :  { %1528 = vmatpush1.bf16.msra.mxu0 %v2976_v55  ;;  %1611 = vmatprep.subr.bf16.mxu1 %v2987_v58  ;;  %v3161_v55 = vld [vmem:[%s4339_s3 + $0x24] ss:$8 sps:$4 sm:$0xff]   ;;  %v3159_v58 = vld [vmem:[%s4339_s3 + $0x20] ss:$8 sps:$4 sm:$0xff]  }
  0x71   :  { %1529 = vmatprep.subr.bf16.mxu0 %v2984_v57  ;;  %v3068_v57 = vld [vmem:[%s4337_s1 + $0x36c] ss:$16 sps:$4 sm:$0xff]  }
  0x73   :  { %1612 = vmatpush1.bf16.msra.mxu1 %v2985_v60  ;;  %v3071_v60 = vld [vmem:[%s4337_s1 + $0x38c] ss:$16 sps:$4 sm:$0xff]  }
  0x74   :  { %1530 = vmatpush1.bf16.msra.mxu0 %v2982_v59  ;;  %1613 = vmatprep.subr.bf16.mxu1 %v2993_v62  ;;  %v3066_v59 = vld [vmem:[%s4337_s1 + $0x368] ss:$16 sps:$4 sm:$0xff]  }
  0x75   :  { %1531 = vmatprep.subr.bf16.mxu0 %v2990_v61  ;;  %v3164_v61 = vld [vmem:[%s4339_s3 + $0x34] ss:$8 sps:$4 sm:$0xff]   ;;  %v3162_v62 = vld [vmem:[%s4339_s3 + $0x30] ss:$8 sps:$4 sm:$0xff]  }
  0x77   :  { %1614 = vmatpush1.bf16.msra.mxu1 %v2991_v0  ;;  %v3069_v0 = vld [vmem:[%s4337_s1 + $0x388] ss:$16 sps:$4 sm:$0xff]  }
  0x78   :  { %1532 = vmatpush1.bf16.msra.mxu0 %v2988_v63  ;;  %1615 = vmatprep.subr.bf16.mxu1 %v2999_v2  ;;  %v3167_v63 = vld [vmem:[%s4339_s3 + $0x44] ss:$8 sps:$4 sm:$0xff]   ;;  %v3165_v2 = vld [vmem:[%s4339_s3 + $0x40] ss:$8 sps:$4 sm:$0xff]  }
  0x79   :  { %1533 = vmatprep.subr.bf16.mxu0 %v2996_v1  ;;  %v3074_v1 = vld [vmem:[%s4337_s1 + $0x3ac] ss:$16 sps:$4 sm:$0xff]  }
  0x7b   :  { %1616 = vmatpush1.bf16.msra.mxu1 %v2997_v4  ;;  %v3072_v4 = vld [vmem:[%s4337_s1 + $0x3a8] ss:$16 sps:$4 sm:$0xff]  }
  0x7c   :  { %1534 = vmatpush1.bf16.msra.mxu0 %v2994_v3  ;;  %1617 = vmatprep.subr.bf16.mxu1 %v3005_v8  ;;  %v3170_v3 = vld [vmem:[%s4339_s3 + $0x54] ss:$8 sps:$4 sm:$0xff]   ;;  %v3168_v8 = vld [vmem:[%s4339_s3 + $0x50] ss:$8 sps:$4 sm:$0xff]  }
  0x7d   :  { %1535 = vmatprep.subr.bf16.mxu0 %v3002_v5  ;;  %v3077_v5 = vld [vmem:[%s4337_s1 + $0x3cc] ss:$16 sps:$4 sm:$0xff]  }
  0x7f   :  { %1618 = vmatpush1.bf16.msra.mxu1 %v3003_v10  ;;  %v3075_v10 = vld [vmem:[%s4337_s1 + $0x3c8] ss:$16 sps:$4 sm:$0xff]  }
  0x80   :  { %1536 = vmatpush1.bf16.msra.mxu0 %v3000_v9  ;;  %1628 = vmatprep.subr.bf16.mxu1 %v3013_v12  ;;  %v3173_v9 = vld [vmem:[%s4339_s3 + $0x64] ss:$8 sps:$4 sm:$0xff]   ;;  %v3171_v12 = vld [vmem:[%s4339_s3 + $0x60] ss:$8 sps:$4 sm:$0xff]  }
  0x81   :  { %1546 = vmatprep.subr.bf16.mxu0 %v3010_v11  ;;  %v3080_v11 = vld [vmem:[%s4337_s1 + $0x3ec] ss:$16 sps:$4 sm:$0xff]  }
  0x82   :  { %1620 = vmatmul.mubr.bf16.vlgmr.msra.gmra.mrb[4].mxu1 %v3545_v6  ;;  %v3025_v6 = vld [vmem:[%s4337_s1 + $0x24c] ss:$16 sps:$4 sm:$0xff]  }
  0x83   :  { %1538 = vmatmul.mubr.bf16.vlgmr.msra.gmra.mrb[0].mxu0 %v3756_v13  ;;  %1629 = vmatpush1.bf16.msra.mxu1 %v3011_v15  ;;  %v3078_v15 = vld [vmem:[%s4337_s1 + $0x3e8] ss:$16 sps:$4 sm:$0xff]  }
  0x84   :  { %1547 = vmatpush1.bf16.msra.mxu0 %v3008_v14  ;;  %1630 = vmatprep.subr.bf16.mxu1 %v3019_v17  ;;  %v3176_v14 = vld [vmem:[%s4339_s3 + $0x74] ss:$8 sps:$4 sm:$0xff]   ;;  %v3174_v17 = vld [vmem:[%s4339_s3 + $0x70] ss:$8 sps:$4 sm:$0xff]  }
  0x85   :  { %1548 = vmatprep.subr.bf16.mxu0 %v3016_v16  ;;  %1578 = vmatprep.mubr.bf16.mxu0 %v3293_v21  ;;  %v3083_v16 = vld [vmem:[%s4337_s1 + $0x40c] ss:$16 sps:$4 sm:$0xff]  }
  0x86   :  { %1660 = vmatprep.mubr.bf16.mxu1 %v3487_v51  ;;  %v3031_v51 = vld [vmem:[%s4337_s1 + $0x26c] ss:$16 sps:$4 sm:$0xff]  }
  0x87   :  { %1631 = vmatpush1.bf16.msra.mxu1 %v3017_v19  ;;  %v3081_v19 = vld [vmem:[%s4337_s1 + $0x408] ss:$16 sps:$4 sm:$0xff]  }
  0x88   :  { %1549 = vmatpush1.bf16.msra.mxu0 %v3014_v18  ;;  %1632 = vmatprep.subr.bf16.mxu1 %v3025_v6  ;;  %v3179_v18 = vld [vmem:[%s4339_s3 + $0x84] ss:$8 sps:$4 sm:$0xff]  }
  0x89   :  { %1550 = vmatprep.subr.bf16.mxu0 %v3022_v20 }
  0x8b   :  { %1633 = vmatpush1.bf16.msra.mxu1 %v3023_v23 }
  0x8c   :  { %1551 = vmatpush1.bf16.msra.mxu0 %v3020_v22  ;;  %1634 = vmatprep.subr.bf16.mxu1 %v3031_v51 }
  0x8d   :  { %1552 = vmatprep.subr.bf16.mxu0 %v3028_v24 }
  0x8f   :  { %1635 = vmatpush1.bf16.msra.mxu1 %v3029_v26 }
  0x90   :  { %1553 = vmatpush1.bf16.msra.mxu0 %v3026_v25  ;;  %1636 = vmatprep.subr.bf16.mxu1 %v3037_v28 }
  0x91   :  { %1554 = vmatprep.subr.bf16.mxu0 %v3034_v27 }
  0x93   :  { %1637 = vmatpush1.bf16.msra.mxu1 %v3035_v30 }
  0x94   :  { %1555 = vmatpush1.bf16.msra.mxu0 %v3032_v29  ;;  %1638 = vmatprep.subr.bf16.mxu1 %v3043_v32 }
  0x95   :  { %1556 = vmatprep.subr.bf16.mxu0 %v3040_v31 }
  0x97   :  { %1639 = vmatpush1.bf16.msra.mxu1 %v3041_v35 }
  0x98   :  { %1557 = vmatpush1.bf16.msra.mxu0 %v3038_v33  ;;  %1640 = vmatprep.subr.bf16.mxu1 %v3049_v37 }
  0x99   :  { %1558 = vmatprep.subr.bf16.mxu0 %v3046_v36 }
  0x9b   :  { %1641 = vmatpush1.bf16.msra.mxu1 %v3047_v39 }
  0x9c   :  { %1559 = vmatpush1.bf16.msra.mxu0 %v3044_v38  ;;  %1642 = vmatprep.subr.bf16.mxu1 %v3055_v41 }
  0x9d   :  { %1560 = vmatprep.subr.bf16.mxu0 %v3052_v40 }
  0x9f   :  { %1643 = vmatpush1.bf16.msra.mxu1 %v3053_v43 }
  0xa0   :  { %1561 = vmatpush1.bf16.msra.mxu0 %v3050_v42  ;;  %1644 = vmatprep.subr.bf16.mxu1 %v3059_v44 }
  0xa1   :  { %2155 = vmatprep.subr.bf16.mxu0 %v3155_v49 }
  0xa3   :  { %1579 = vmatmul.mubr.bf16.vlgmr.msra.gmra.mrb[0].mxu0 %v3858_v45  ;;  %1645 = vmatpush1.bf16.msra.mxu1 %v3057_v46 }
  0xa4   :  { %1646 = vmatprep.subr.bf16.mxu1 %v3062_v47  ;;  %2156 = vmatpush1.bf16.msra.mxu0 %v3153_v48 }
  0xa5   :  { %2157 = vmatprep.subr.bf16.mxu0 %v3158_v52 }
  0xa7   :  { %1647 = vmatpush1.bf16.msra.mxu1 %v3060_v50 }
  0xa8   :  { %1648 = vmatprep.subr.bf16.mxu1 %v3065_v53  ;;  %2158 = vmatpush1.bf16.msra.mxu0 %v3156_v54 }
  0xa9   :  { %2159 = vmatprep.subr.bf16.mxu0 %v3161_v55 }
  0xab   :  { %1649 = vmatpush1.bf16.msra.mxu1 %v3063_v56 }
  0xac   :  { %1650 = vmatprep.subr.bf16.mxu1 %v3068_v57  ;;  %2160 = vmatpush1.bf16.msra.mxu0 %v3159_v58 }
  0xad   :  { %2161 = vmatprep.subr.bf16.mxu0 %v3164_v61 }
  0xaf   :  { %1651 = vmatpush1.bf16.msra.mxu1 %v3066_v59 }
  0xb0   :  { %1652 = vmatprep.subr.bf16.mxu1 %v3071_v60  ;;  %2162 = vmatpush1.bf16.msra.mxu0 %v3162_v62 }
  0xb1   :  { %2163 = vmatprep.subr.bf16.mxu0 %v3167_v63 }
  0xb3   :  { %1653 = vmatpush1.bf16.msra.mxu1 %v3069_v0 }
  0xb4   :  { %1654 = vmatprep.subr.bf16.mxu1 %v3074_v1  ;;  %2164 = vmatpush1.bf16.msra.mxu0 %v3165_v2 }
  0xb5   :  { %2165 = vmatprep.subr.bf16.mxu0 %v3170_v3 }
  0xb7   :  { %1655 = vmatpush1.bf16.msra.mxu1 %v3072_v4 }
  0xb8   :  { %1656 = vmatprep.subr.bf16.mxu1 %v3077_v5  ;;  %2166 = vmatpush1.bf16.msra.mxu0 %v3168_v8 }
  0xb9   :  { %2167 = vmatprep.subr.bf16.mxu0 %v3173_v9 }
  0xbb   :  { %1657 = vmatpush1.bf16.msra.mxu1 %v3075_v10 }
  0xbc   :  { %1658 = vmatprep.subr.bf16.mxu1 %v3080_v11  ;;  %2168 = vmatpush1.bf16.msra.mxu0 %v3171_v12 }
  0xbd   :  { %2169 = vmatprep.subr.bf16.mxu0 %v3176_v14 }
  0xbf   :  { %1659 = vmatpush1.bf16.msra.mxu1 %v3078_v15 }
  0xc0   :  { %12 = vsyncpa [#allocation3], 0  ;;  %1669 = vmatprep.subr.bf16.mxu1 %v3083_v16  ;;  %v3086_v20 = vld [vmem:[%s4337_s1 + $0x42c] ss:$16 sps:$4 sm:$0xff]   ;;  %2170 = vmatpush1.bf16.msra.mxu0 %v3174_v17  ;;  %v3177_v6 = vld [vmem:[%s4339_s3 + $0x80] ss:$8 sps:$4 sm:$0xff]  }
  0xc1   :  { %2171 = vmatprep.subr.bf16.mxu0 %v3179_v18  ;;  %v3182_v22 = vld [vmem:[%s4339_s3 + $0x94] ss:$8 sps:$4 sm:$0xff]   ;;  %v3084_v23 = vld [vmem:[%s4337_s1 + $0x428] ss:$16 sps:$4 sm:$0xff]   ;;  %v3185_v51 = vld [vmem:[%s4339_s3 + $0xa4] ss:$8 sps:$4 sm:$0xff]  }
  0xc2   :  { %1661 = vmatmul.mubr.bf16.vlgmr.msra.gmra.mrb[4].mxu1 %v3547_v7  ;;  %v3089_v24 = vld [vmem:[%s4337_s1 + $0x44c] ss:$16 sps:$4 sm:$0xff]   ;;  %v3180_v7 = vld [vmem:[%s4339_s3 + $0x90] ss:$8 sps:$4 sm:$0xff]   ;;  %v3183_v26 = vld [vmem:[%s4339_s3 + $0xa0] ss:$8 sps:$4 sm:$0xff]  }
  0xc3   :  { %1670 = vmatpush1.bf16.msra.mxu1 %v3081_v19  ;;  %1701 = vmatprep.mubr.bf16.mxu1 %v3634_v34  ;;  %v3087_v34 = vld [vmem:[%s4337_s1 + $0x448] ss:$16 sps:$4 sm:$0xff]   ;;  %v3092_v25 = vld [vmem:[%s4337_s1 + $0x46c] ss:$16 sps:$4 sm:$0xff]   ;;  %s3294_s25 = smov [#allocation2]  }
  0xc4   :  { %1671 = vmatprep.subr.bf16.mxu1 %v3086_v20  ;;  %2172 = vmatpush1.bf16.msra.mxu0 %v3177_v6  ;;  %v3188_v27 = vld [vmem:[%s4339_s3 + $0xb4] ss:$8 sps:$4 sm:$0xff]   ;;  %v3090_v28 = vld [vmem:[%s4337_s1 + $0x468] ss:$16 sps:$4 sm:$0xff]   ;;  %v3191_v31 = vld [vmem:[%s4339_s3 + $0xc4] ss:$8 sps:$4 sm:$0xff]  }
  0xc5   :  { %2173 = vmatprep.subr.bf16.mxu0 %v3182_v22  ;;  %v3095_v29 = vld [vmem:[%s4337_s1 + $0x48c] ss:$16 sps:$4 sm:$0xff]   ;;  %v3186_v30 = vld [vmem:[%s4339_s3 + $0xb0] ss:$8 sps:$4 sm:$0xff]   ;;  %v3189_v35 = vld [vmem:[%s4339_s3 + $0xc0] ss:$8 sps:$4 sm:$0xff]  }
  0xc6   :  { %v3093_v32 = vld [vmem:[%s4337_s1 + $0x488] ss:$16 sps:$4 sm:$0xff]   ;;  %v3098_v33 = vld [vmem:[%s4337_s1 + $0x4ac] ss:$16 sps:$4 sm:$0xff]   ;;  %s2434_s26 = sshll.u32 %s3294_s25, 4  ;;  %s2435_s26 = int_to_ptr.vmem [resolvable:$true] %s2434_s26 }
  0xc7   :  { %1672 = vmatpush1.bf16.msra.mxu1 %v3084_v23  ;;  %v3194_v36 = vld [vmem:[%s4339_s3 + $0xd4] ss:$8 sps:$4 sm:$0xff]   ;;  %v3096_v37 = vld [vmem:[%s4337_s1 + $0x4a8] ss:$16 sps:$4 sm:$0xff]   ;;  %v3197_v58 = vld [vmem:[%s4339_s3 + $0xe4] ss:$8 sps:$4 sm:$0xff]   ;;  %v258_v23 = vlaneseq  ;;  %p3274_p1 = scmp.lt.s32.totalorder %s2435_s26, %s2435_s26 }
  0xc8   :  { %1673 = vmatprep.subr.bf16.mxu1 %v3089_v24  ;;  %2174 = vmatpush1.bf16.msra.mxu0 %v3180_v7  ;;  %v3101_v38 = vld [vmem:[%s4337_s1 + $0x4cc] ss:$16 sps:$4 sm:$0xff]   ;;  %v3192_v39 = vld [vmem:[%s4339_s3 + $0xd0] ss:$8 sps:$4 sm:$0xff]   ;;  %v3195_v59 = vld [vmem:[%s4339_s3 + $0xe0] ss:$8 sps:$4 sm:$0xff]  }
  0xc9   :  { %2175 = vmatprep.subr.bf16.mxu0 %v3185_v51  ;;  %v3099_v40 = vld [vmem:[%s4337_s1 + $0x4c8] ss:$16 sps:$4 sm:$0xff]   ;;  %v3104_v41 = vld [vmem:[%s4337_s1 + $0x4ec] ss:$16 sps:$4 sm:$0xff]   ;;  %v4154_v24 = vshrl.u32 %v258_v23, 7 }
  0xca   :  { %v3102_v42 = vld [vmem:[%s4337_s1 + $0x4e8] ss:$16 sps:$4 sm:$0xff]   ;;  %v3107_v43 = vld [vmem:[%s4337_s1 + $0x50c] ss:$16 sps:$4 sm:$0xff]   ;;  %v4160_v51 = vld [vmem:[%s4338_s2] sm:$0xf] }
  0xcb   :  { %1674 = vmatpush1.bf16.msra.mxu1 %v3087_v34  ;;  %v3105_v44 = vld [vmem:[%s4337_s1 + $0x508] ss:$16 sps:$4 sm:$0xff]   ;;  %v3110_v46 = vld [vmem:[%s4337_s1 + $0x52c] ss:$16 sps:$4 sm:$0xff]   ;;  %v260_v7 = vsub.s32 0, %v4154_v24  ;;  %v264_v34 = vsub.s32 1, %v4154_v24 }
  0xcc   :  { %1675 = vmatprep.subr.bf16.mxu1 %v3092_v25  ;;  %2176 = vmatpush1.bf16.msra.mxu0 %v3183_v26  ;;  %v3108_v47 = vld [vmem:[%s4337_s1 + $0x528] ss:$16 sps:$4 sm:$0xff]   ;;  %v3113_v48 = vld [vmem:[%s4337_s1 + $0x54c] ss:$16 sps:$4 sm:$0xff]  }
  0xcd   :  { %2177 = vmatprep.subr.bf16.mxu0 %v3188_v27  ;;  %v3111_v49 = vld [vmem:[%s4337_s1 + $0x548] ss:$16 sps:$4 sm:$0xff]   ;;  %v3116_v50 = vld [vmem:[%s4337_s1 + $0x56c] ss:$16 sps:$4 sm:$0xff]   ;;  %v261_v25 = vrot.slane %v4160_v51, %v260_v7 }
  0xce   :  { %v3114_v52 = vld [vmem:[%s4337_s1 + $0x568] ss:$16 sps:$4 sm:$0xff]   ;;  %v3119_v53 = vld [vmem:[%s4337_s1 + $0x58c] ss:$16 sps:$4 sm:$0xff]  }
  0xcf   :  { %1676 = vmatpush1.bf16.msra.mxu1 %v3090_v28  ;;  %v3117_v54 = vld [vmem:[%s4337_s1 + $0x588] ss:$16 sps:$4 sm:$0xff]   ;;  %v3122_v55 = vld [vmem:[%s4337_s1 + $0x5ac] ss:$16 sps:$4 sm:$0xff]  }
  0xd0   :  { %1677 = vmatprep.subr.bf16.mxu1 %v3095_v29  ;;  %2178 = vmatpush1.bf16.msra.mxu0 %v3186_v30  ;;  %v3120_v56 = vld [vmem:[%s4337_s1 + $0x5a8] ss:$16 sps:$4 sm:$0xff]   ;;  %v3125_v57 = vld [vmem:[%s4337_s1 + $0x5cc] ss:$16 sps:$4 sm:$0xff]  }
  0xd1   :  { %2179 = vmatprep.subr.bf16.mxu0 %v3191_v31  ;;  %v3123_v60 = vld [vmem:[%s4337_s1 + $0x5c8] ss:$16 sps:$4 sm:$0xff]   ;;  %v3128_v61 = vld [vmem:[%s4337_s1 + $0x5ec] ss:$16 sps:$4 sm:$0xff]  }
  0xd2   :  { %v3200_v62 = vld [vmem:[%s4339_s3 + $0xf4] ss:$8 sps:$4 sm:$0xff]   ;;  %v3198_v63 = vld [vmem:[%s4339_s3 + $0xf0] ss:$8 sps:$4 sm:$0xff]   ;;  %v3203_v2 = vld [vmem:[%s4339_s3 + $0x104] ss:$8 sps:$4 sm:$0xff]  }
  0xd3   :  { %1678 = vmatpush1.bf16.msra.mxu1 %v3093_v32  ;;  %v3126_v0 = vld [vmem:[%s4337_s1 + $0x5e8] ss:$16 sps:$4 sm:$0xff]   ;;  %v3131_v1 = vld [vmem:[%s4337_s1 + $0x60c] ss:$16 sps:$4 sm:$0xff]  }
  0xd4   :  { %1679 = vmatprep.subr.bf16.mxu1 %v3098_v33  ;;  %2180 = vmatpush1.bf16.msra.mxu0 %v3189_v35  ;;  %v3129_v3 = vld [vmem:[%s4337_s1 + $0x608] ss:$16 sps:$4 sm:$0xff]   ;;  %v3134_v4 = vld [vmem:[%s4337_s1 + $0x62c] ss:$16 sps:$4 sm:$0xff]  }
  0xd5   :  { %2181 = vmatprep.subr.bf16.mxu0 %v3194_v36  ;;  %v3132_v5 = vld [vmem:[%s4337_s1 + $0x628] ss:$16 sps:$4 sm:$0xff]   ;;  %v3137_v8 = vld [vmem:[%s4337_s1 + $0x64c] ss:$16 sps:$4 sm:$0xff]  }
  0xd6   :  { %v3135_v9 = vld [vmem:[%s4337_s1 + $0x648] ss:$16 sps:$4 sm:$0xff]   ;;  %v3143_v10 = vld [vmem:[%s4337_s1 + $0x68c] ss:$16 sps:$4 sm:$0xff]  }
  0xd7   :  { %1680 = vmatpush1.bf16.msra.mxu1 %v3096_v37  ;;  %v3141_v11 = vld [vmem:[%s4337_s1 + $0x688] ss:$16 sps:$4 sm:$0xff]   ;;  %v3146_v12 = vld [vmem:[%s4337_s1 + $0x6ac] ss:$16 sps:$4 sm:$0xff]  }
  0xd8   :  { %1681 = vmatprep.subr.bf16.mxu1 %v3101_v38  ;;  %2182 = vmatpush1.bf16.msra.mxu0 %v3192_v39  ;;  %v3144_v14 = vld [vmem:[%s4337_s1 + $0x6a8] ss:$16 sps:$4 sm:$0xff]   ;;  %v3149_v15 = vld [vmem:[%s4337_s1 + $0x6cc] ss:$16 sps:$4 sm:$0xff]  }
  0xd9   :  { %2183 = vmatprep.subr.bf16.mxu0 %v3197_v58  ;;  %v3147_v19 = vld [vmem:[%s4337_s1 + $0x6c8] ss:$16 sps:$4 sm:$0xff]   ;;  %v3152_v6 = vld [vmem:[%s4337_s1 + $0x6ec] ss:$16 sps:$4 sm:$0xff]  }
  0xda   :  { %v3150_v22 = vld [vmem:[%s4337_s1 + $0x6e8] ss:$16 sps:$4 sm:$0xff]  }
  0xdb   :  { %1682 = vmatpush1.bf16.msra.mxu1 %v3099_v40  ;;  %v3201_v38 = vld [vmem:[%s4339_s3 + $0x100] ss:$8 sps:$4 sm:$0xff]   ;;  %v3206_v40 = vld [vmem:[%s4339_s3 + $0x114] ss:$8 sps:$4 sm:$0xff]  }
  0xdc   :  { %1683 = vmatprep.subr.bf16.mxu1 %v3104_v41  ;;  %2184 = vmatpush1.bf16.msra.mxu0 %v3195_v59  ;;  %v3249_v41 = vld [vmem:[%s4341_s5 + $0x40] sm:$0xff]   ;;  %v3218_v59 = vld [vmem:[%s4339_s3 + $0x154] ss:$8 sps:$4 sm:$0xff]  }
  0xdd   :  { %2185 = vmatprep.subr.bf16.mxu0 %v3200_v62  ;;  %v3213_v58 = vld [vmem:[%s4339_s3 + $0x140] ss:$8 sps:$4 sm:$0xff]   ;;  %v3216_v62 = vld [vmem:[%s4339_s3 + $0x150] ss:$8 sps:$4 sm:$0xff]  }
  0xdf   :  { %1684 = vmatpush1.bf16.msra.mxu1 %v3102_v42  ;;  %v3250_v42 = vld [vmem:[%s4341_s5] sm:$0xff]  }
  0xe0   :  { %1685 = vmatprep.subr.bf16.mxu1 %v3107_v43  ;;  %2186 = vmatpush1.bf16.msra.mxu0 %v3198_v63  ;;  %v3251_v43 = vld [vmem:[%s4341_s5 + $0x48] sm:$0xff]  }
  0xe1   :  { %2196 = vmatprep.subr.bf16.mxu0 %v3203_v2  ;;  %v3221_v63 = vld [vmem:[%s4339_s3 + $0x164] ss:$8 sps:$4 sm:$0xff]   ;;  %v3224_v2 = vld [vmem:[%s4339_s3 + $0x174] ss:$8 sps:$4 sm:$0xff]  }
  0xe3   :  { %1686 = vmatpush1.bf16.msra.mxu1 %v3105_v44  ;;  %v3204_v44 = vld [vmem:[%s4339_s3 + $0x110] ss:$8 sps:$4 sm:$0xff]  }
  0xe4   :  { %1687 = vmatprep.subr.bf16.mxu1 %v3110_v46  ;;  %v3209_v46 = vld [vmem:[%s4339_s3 + $0x124] ss:$8 sps:$4 sm:$0xff]  }
  0xe7   :  { %1688 = vmatpush1.bf16.msra.mxu1 %v3108_v47  ;;  %v3252_v47 = vld [vmem:[%s4341_s5 + $0x8] sm:$0xff]  }
  0xe8   :  { %1689 = vmatprep.subr.bf16.mxu1 %v3113_v48  ;;  %v3253_v48 = vld [vmem:[%s4341_s5 + $0x50] sm:$0xff]  }
  0xeb   :  { %1690 = vmatpush1.bf16.msra.mxu1 %v3111_v49  ;;  %v3207_v49 = vld [vmem:[%s4339_s3 + $0x120] ss:$8 sps:$4 sm:$0xff]  }
  0xec   :  { %1691 = vmatprep.subr.bf16.mxu1 %v3116_v50  ;;  %v3212_v50 = vld [vmem:[%s4339_s3 + $0x134] ss:$8 sps:$4 sm:$0xff]  }
  0xef   :  { %1692 = vmatpush1.bf16.msra.mxu1 %v3114_v52  ;;  %v3254_v52 = vld [vmem:[%s4341_s5 + $0x10] sm:$0xff]  }
  0xf0   :  { %1693 = vmatprep.subr.bf16.mxu1 %v3119_v53  ;;  %v3255_v53 = vld [vmem:[%s4341_s5 + $0x58] sm:$0xff]  }
  0xf3   :  { %1694 = vmatpush1.bf16.msra.mxu1 %v3117_v54  ;;  %v3210_v54 = vld [vmem:[%s4339_s3 + $0x130] ss:$8 sps:$4 sm:$0xff]  }
  0xf4   :  { %1695 = vmatprep.subr.bf16.mxu1 %v3122_v55  ;;  %v3215_v55 = vld [vmem:[%s4339_s3 + $0x144] ss:$8 sps:$4 sm:$0xff]  }
  0xf7   :  { %1696 = vmatpush1.bf16.msra.mxu1 %v3120_v56  ;;  %v3256_v56 = vld [vmem:[%s4341_s5 + $0x18] sm:$0xff]  }
  0xf8   :  { %1697 = vmatprep.subr.bf16.mxu1 %v3125_v57  ;;  %v3257_v57 = vld [vmem:[%s4341_s5 + $0x60] sm:$0xff]  }
  0xfb   :  { %1698 = vmatpush1.bf16.msra.mxu1 %v3123_v60  ;;  %v3258_v60 = vld [vmem:[%s4341_s5 + $0x20] sm:$0xff]  }
  0xfc   :  { %1699 = vmatprep.subr.bf16.mxu1 %v3128_v61  ;;  %v3259_v61 = vld [vmem:[%s4341_s5 + $0x68] sm:$0xff]  }
  0xff   :  { %1700 = vmatpush1.bf16.msra.mxu1 %v3126_v0  ;;  %v3260_v0 = vld [vmem:[%s4341_s5 + $0x28] sm:$0xff]  }
 0x100   :  { %1710 = vmatprep.subr.bf16.mxu1 %v3131_v1  ;;  %v3219_v1 = vld [vmem:[%s4339_s3 + $0x160] ss:$8 sps:$4 sm:$0xff]  }
 0x102   :  { %1702 = vmatmul.mubr.bf16.vlgmr.msra.gmra.mrb[4].mxu1 %v3756_v13  ;;  %v3140_v13 = vld [vmem:[%s4337_s1 + $0x66c] ss:$16 sps:$4 sm:$0xff]  }
 0x103   :  { %1711 = vmatpush1.bf16.msra.mxu1 %v3129_v3  ;;  %1742 = vmatprep.mubr.bf16.mxu1 %v3293_v21  ;;  %v3138_v21 = vld [vmem:[%s4337_s1 + $0x668] ss:$16 sps:$4 sm:$0xff]  }
 0x104   :  { %1712 = vmatprep.subr.bf16.mxu1 %v3134_v4  ;;  %v3222_v3 = vld [vmem:[%s4339_s3 + $0x170] ss:$8 sps:$4 sm:$0xff]   ;;  %v3227_v4 = vld [vmem:[%s4339_s3 + $0x184] ss:$8 sps:$4 sm:$0xff]  }
 0x107   :  { %1713 = vmatpush1.bf16.msra.mxu1 %v3132_v5  ;;  %v3225_v5 = vld [vmem:[%s4339_s3 + $0x180] ss:$8 sps:$4 sm:$0xff]  }
 0x108   :  { %1714 = vmatprep.subr.bf16.mxu1 %v3137_v8  ;;  %v3230_v8 = vld [vmem:[%s4339_s3 + $0x194] ss:$8 sps:$4 sm:$0xff]  }
 0x10b   :  { %1715 = vmatpush1.bf16.msra.mxu1 %v3135_v9  ;;  %v3228_v9 = vld [vmem:[%s4339_s3 + $0x190] ss:$8 sps:$4 sm:$0xff]  }
 0x10c   :  { %1716 = vmatprep.subr.bf16.mxu1 %v3140_v13  ;;  %v3233_v13 = vld [vmem:[%s4339_s3 + $0x1a4] ss:$8 sps:$4 sm:$0xff]  }
 0x10f   :  { %1717 = vmatpush1.bf16.msra.mxu1 %v3138_v21  ;;  %v3231_v21 = vld [vmem:[%s4339_s3 + $0x1a0] ss:$8 sps:$4 sm:$0xff]  }
 0x110   :  { %1718 = vmatprep.subr.bf16.mxu1 %v3143_v10  ;;  %v3236_v10 = vld [vmem:[%s4339_s3 + $0x1b4] ss:$8 sps:$4 sm:$0xff]  }
 0x113   :  { %1719 = vmatpush1.bf16.msra.mxu1 %v3141_v11  ;;  %v3234_v11 = vld [vmem:[%s4339_s3 + $0x1b0] ss:$8 sps:$4 sm:$0xff]  }
 0x114   :  { %1720 = vmatprep.subr.bf16.mxu1 %v3146_v12  ;;  %v3239_v12 = vld [vmem:[%s4339_s3 + $0x1c4] ss:$8 sps:$4 sm:$0xff]  }
 0x115   :  { %v1457_v16 = vpop.f32.mrb[0].mxu1 }
 0x116   :  { %v1459_v17 = vpop.f32.mrb[1].mxu1  ;;  %v1458_v26 = vadd.f32 %v1457_v16, %v261_v25  ;;  %v3240_v16 = vld [vmem:[%s4339_s3 + $0x1d0] ss:$8 sps:$4 sm:$0xff]  }
 0x117   :  { %v1461_v18 = vpop.f32.mrb[2].mxu1  ;;  %1721 = vmatpush1.bf16.msra.mxu1 %v3144_v14  ;;  %v3237_v14 = vld [vmem:[%s4339_s3 + $0x1c0] ss:$8 sps:$4 sm:$0xff]  }
 0x118   :  { %v1462_v20 = vpop.f32.mrb[3].mxu1  ;;  %1722 = vmatprep.subr.bf16.mxu1 %v3149_v15  ;;  %v3242_v15 = vld [vmem:[%s4339_s3 + $0x1d4] ss:$8 sps:$4 sm:$0xff]   ;;  %v3243_v18 = vld [vmem:[%s4339_s3 + $0x1e0] ss:$8 sps:$4 sm:$0xff]  }
 0x119   :  { %v3246_v20 = vld [vmem:[%s4339_s3 + $0x1f0] ss:$8 sps:$4 sm:$0xff]  }
 0x11b   :  { %1723 = vmatpush1.bf16.msra.mxu1 %v3147_v19  ;;  %v3248_v19 = vld [vmem:[%s4339_s3 + $0x1f4] ss:$8 sps:$4 sm:$0xff]  }
 0x11c   :  { %1724 = vmatprep.subr.bf16.mxu1 %v3152_v6  ;;  %v268_v6 = vsub.s32 2, %v4154_v24 }
 0x11e   :  { %v269_v23 = vrot.slane %v4160_v51, %v268_v6 }
 0x11f   :  { %1725 = vmatpush1.bf16.msra.mxu1 %v3150_v22  ;;  %v272_v22 = vsub.s32 3, %v4154_v24 }
 0x120   :  { %2754 = vmatprep.subr.bf16.mxu1 %v3249_v41 }
 0x121   :  { %v273_v25 = vrot.slane %v4160_v51, %v272_v22 }
 0x122   :  { %1743 = vmatmul.mubr.bf16.vlgmr.msra.gmra.mrb[4].mxu1 %v3858_v45  ;;  %v265_v45 = vrot.slane %v4160_v51, %v264_v34  ;;  %v3262_v51 = vld [vmem:[%s4341_s5 + $0x30] sm:$0xff]  }
 0x123   :  { %2755 = vmatpush3.bf16.msra.mxu1 %v3250_v42 }
 0x124   :  { %v1460_v27 = vadd.f32 %v1459_v17, %v265_v45  ;;  %2756 = vmatprep.subr.bf16.mxu1 %v3251_v43  ;;  %v3245_v17 = vld [vmem:[%s4339_s3 + $0x1e4] ss:$8 sps:$4 sm:$0xff]  }
 0x127   :  { %2757 = vmatpush3.bf16.msra.mxu1 %v3252_v47 }
 0x128   :  { %2758 = vmatprep.subr.bf16.mxu1 %v3253_v48 }
 0x12b   :  { %2759 = vmatpush3.bf16.msra.mxu1 %v3254_v52 }
 0x12c   :  { %2760 = vmatprep.subr.bf16.mxu1 %v3255_v53 }
 0x12f   :  { %2761 = vmatpush3.bf16.msra.mxu1 %v3256_v56 }
 0x130   :  { %2762 = vmatprep.subr.bf16.mxu1 %v3257_v57 }
 0x133   :  { %2763 = vmatpush3.bf16.msra.mxu1 %v3258_v60 }
 0x134   :  { %2764 = vmatprep.subr.bf16.mxu1 %v3259_v61 }
 0x137   :  { %2765 = vmatpush3.bf16.msra.mxu1 %v3260_v0 }
 0x176   :  { %v1580_v28 = vpop.f32.mrb[0].mxu0 }
 0x177   :  { %v2777_v29 = vadd.f32 %v1580_v28, %v1458_v26  ;;  %v1582_v30 = vpop.f32.mrb[1].mxu0 }
 0x178   :  { %v2779_v31 = vadd.f32 %v1582_v30, %v1460_v27  ;;  %v1584_v32 = vpop.f32.mrb[2].mxu0 }
 0x179   :  { %v1751_v33 = vmax.f32 %v2777_v29, 0.0  ;;  %v1585_v35 = vpop.f32.mrb[3].mxu0 }
 0x17a   :  { %v1752_v36 = vmax.f32 %v2779_v31, 0.0 }
 0x17b   :  { %v1755_v39 = vpack.c.bf16 %v1751_v33, %v1751_v33 }
 0x17c   :  { %v1756_v37 = vpack.c.bf16 %v1752_v36, %v1752_v36  ;;  %v3261_v36 = vld [vmem:[%s4341_s5 + $0x70] sm:$0xff]  }
 0x17d   :  { %2766 = vmatprep.subr.bf16.mxu1 %v3261_v36 }
 0x17e   :  { %2187 = vmatprep.mubr.bf16.mxu0 %v1756_v37  ;;  %2767 = vmatpush3.bf16.msra.mxu1 %v3262_v51  ;;  %v3263_v37 = vld [vmem:[%s4341_s5 + $0x78] sm:$0xff]  }
 0x17f   :  { %2188 = vmatmul.mubr.bf16.vlgmr.msra.gmra.mrb[4].mxu0 %v1755_v39  ;;  %2768 = vmatprep.subr.bf16.mxu1 %v3263_v37  ;;  %v1823_v39 = vld [vmem:[%s4340_s4] sm:$0x3] }
 0x180   :  { %2197 = vmatpush1.bf16.msra.mxu0 %v3201_v38  ;;  %v3264_v38 = vld [vmem:[%s4341_s5 + $0x38] sm:$0xff]   ;;  %v1832_v41 = vrot.slane %v1823_v39, %v264_v34 }
 0x181   :  { %2198 = vmatprep.subr.bf16.mxu0 %v3206_v40  ;;  %v1828_v40 = vrot.slane %v1823_v39, %v260_v7  ;;  %v2737_v7 = vld [vmem:[%s4342_s6] ss:$0 sm:$0xff]  ;;  %s3269_s6 = scalar_lea.vmem %s2435_s26, 128 }
 0x182   :  { %2769 = vmatpush3.bf16.msra.mxu1 %v3264_v38  ;;  %p3270_p0 = scmp.ne.s32.totalorder %s2435_s26, %s3269_s6  ;;  %p3275_p2 = scmp.lt.s32.totalorder %s3269_s6, %s3269_s6 }
 0x184   :  { %2199 = vmatpush1.bf16.msra.mxu0 %v3204_v44  ;;  %p3276_p3 = por %p3275_p2, %p3274_p1 }
 0x185   :  { %2200 = vmatprep.subr.bf16.mxu0 %v3209_v46 }
 0x186   :  { %p3277_p4 = pnand %p3276_p3, %p3270_p0 }
 0x188   :  { %2201 = vmatpush1.bf16.msra.mxu0 %v3207_v49 }
 0x189   :  { %2202 = vmatprep.subr.bf16.mxu0 %v3212_v50 }
 0x18c   :  { %2203 = vmatpush1.bf16.msra.mxu0 %v3210_v54 }
 0x18d   :  { %2204 = vmatprep.subr.bf16.mxu0 %v3215_v55 }
 0x190   :  { %2205 = vmatpush1.bf16.msra.mxu0 %v3213_v58 }
 0x191   :  { %2206 = vmatprep.subr.bf16.mxu0 %v3218_v59 }
 0x194   :  { %2207 = vmatpush1.bf16.msra.mxu0 %v3216_v62 }
 0x195   :  { %2208 = vmatprep.subr.bf16.mxu0 %v3221_v63 }
 0x198   :  { %2209 = vmatpush1.bf16.msra.mxu0 %v3219_v1 }
 0x199   :  { %2210 = vmatprep.subr.bf16.mxu0 %v3224_v2 }
 0x19c   :  { %2211 = vmatpush1.bf16.msra.mxu0 %v3222_v3 }
 0x19d   :  { %2212 = vmatprep.subr.bf16.mxu0 %v3227_v4 }
 0x1a0   :  { %2213 = vmatpush1.bf16.msra.mxu0 %v3225_v5 }
 0x1a1   :  { %2214 = vmatprep.subr.bf16.mxu0 %v3230_v8 }
 0x1a4   :  { %2215 = vmatpush1.bf16.msra.mxu0 %v3228_v9 }
 0x1a5   :  { %2216 = vmatprep.subr.bf16.mxu0 %v3233_v13 }
 0x1a8   :  { %2217 = vmatpush1.bf16.msra.mxu0 %v3231_v21 }
 0x1a9   :  { %2218 = vmatprep.subr.bf16.mxu0 %v3236_v10 }
 0x1ac   :  { %2219 = vmatpush1.bf16.msra.mxu0 %v3234_v11 }
 0x1ad   :  { %2220 = vmatprep.subr.bf16.mxu0 %v3239_v12 }
 0x1b0   :  { %2221 = vmatpush1.bf16.msra.mxu0 %v3237_v14 }
 0x1b1   :  { %2222 = vmatprep.subr.bf16.mxu0 %v3242_v15 }
 0x1b4   :  { %2223 = vmatpush1.bf16.msra.mxu0 %v3240_v16 }
 0x1b5   :  { %2224 = vmatprep.subr.bf16.mxu0 %v3245_v17 }
 0x1b8   :  { %2225 = vmatpush1.bf16.msra.mxu0 %v3243_v18 }
 0x1b9   :  { %2226 = vmatprep.subr.bf16.mxu0 %v3248_v19 }
 0x1bc   :  { %2227 = vmatpush1.bf16.msra.mxu0 %v3246_v20 }
 0x1f5   :  { %v1744_v45 = vpop.f32.mrb[4].mxu1 }
 0x1f6   :  { %v2780_v26 = vadd.f32 %v1744_v45, %v269_v23  ;;  %v1746_v27 = vpop.f32.mrb[5].mxu1 }
 0x1f7   :  { %v2781_v28 = vadd.f32 %v1746_v27, %v273_v25  ;;  %v1748_v29 = vpop.f32.mrb[6].mxu1 }
 0x1f8   :  { %v1753_v30 = vmax.f32 %v2780_v26, 0.0  ;;  %v1749_v31 = vpop.f32.mrb[7].mxu1 }
 0x1f9   :  { %v1754_v32 = vmax.f32 %v2781_v28, 0.0 }
 0x1fa   :  { %v1757_v35 = vpack.c.bf16 %v1753_v30, %v1753_v30 }
 0x1fb   :  { %v1758_v33 = vpack.c.bf16 %v1754_v32, %v1754_v32 }
 0x1fd   :  { %2228 = vmatprep.mubr.bf16.mxu0 %v1758_v33 }
 0x1fe   :  { %2229 = vmatmul.mubr.bf16.vlgmr.msra.gmra.mrb[4].mxu0 %v1757_v35 }
 0x2d1   :  { %v2230_v42 = vpop.f32.mrb[4].mxu0 }
 0x2d2   :  { %v2782_v43 = vadd.f32 %v2230_v42, %v1828_v40  ;;  %v2232_v44 = vpop.f32.mrb[5].mxu0 }
 0x2d3   :  { %v2783_v46 = vadd.f32 %v2232_v44, %v1832_v41  ;;  %v2234_v47 = vpop.f32.mrb[6].mxu0 }
 0x2d4   :  { %v2237_v48 = vmax.f32 %v2782_v43, 0.0  ;;  %v2235_v49 = vpop.f32.mrb[7].mxu0 }
 0x2d5   :  { %v2238_v50 = vmax.f32 %v2783_v46, 0.0 }
 0x2d6   :  { %v2239_v53 = vpack.c.bf16 %v2237_v48, %v2237_v48 }
 0x2d7   :  { %v2240_v52 = vpack.c.bf16 %v2238_v50, %v2238_v50 }
 0x2d9   :  { %2408 = vmatprep.mubr.bf16.mxu1 %v2240_v52 }
 0x2da   :  { %2409 = vmatmul.mubr.bf16.vlgmr.msra.gmra.mrb[8].mxu1 %v2239_v53 }
 0x3ad   :  { %v2770_v54 = vpop.f32.mrb[8].mxu1 }
 0x3ae   :  { %v2771_v55 = vpop.f32.mrb[9].mxu1 }
 0x3af   :  { %v2772_v24 = vadd.f32 %v2771_v55, %v2770_v54  ;;  %v2773_v34 = vpop.f32.mrb[10].mxu1 }
 0x3b0   :  { %v2774_v56 = vpop.f32.mrb[11].mxu1 }
 0x3b1   :  { %v2411_v57 = vadd.f32 %v2772_v24, %v2737_v7 }
 0x3b3   :  { %2416 = vmax.xlane.f32.xlu0 %v2411_v57 }
 0x440   :  { %v2417_v58 = vpop.xlane.xlu0 %2416 }
 0x441   :  { %v2418_v59 = vsub.f32 %v2411_v57, %v2417_v58 }
 0x443   :  { %v2419_v60 = vmul.f32 1.442695, %v2418_v59 }
 0x445   :  { %3265 = vpow2.f32 %v2419_v60 }
 0x44f   :  { %v3266_v61 = vpop.eup %3265 }
 0x450   :  { %2421 = vadd.xlane.f32.xlu0 %v3266_v61 }
 0x4dd   :  { %v2422_v62 = vpop.xlane.xlu0 %2421 }
 0x4de   :  { %3267 = vlog2.f32 %v2422_v62 }
 0x4e8   :  { %v3268_v63 = vpop.eup %3267 }
 0x4e9   :  { %v2424_v0 = vmul.f32 0.6931472, %v3268_v63 }
 0x4eb   :  { %v2425_v1 = vadd.f32 %v2424_v0, %v2417_v58 }
 0x4ed   :  { %v2426_v2 = vsub.f32 %v2411_v57, %v2425_v1 }
 0x4ef   :  { %2427 = vst [vmem:[#allocation2] sm:$0xff] %v2426_v2 }
 0x4f0   :  { %3280 = shalt.err (!%p3277_p4)
}
 0x4f1   :  { %s3281_s29 = scalar_lea.hbm %s4343_s7, 128 }
 0x4f2   :  { %p3282_p5 = scmp.ne.s32.totalorder %s4343_s7, %s3281_s29  ;;  %p3285_p6 = scmp.lt.u32.totalorder %s3281_s29, %s4343_s7 }
 0x4f4   :  { %p3287_p7 = pnand %p3285_p6, %p3282_p5 }
 0x4f6   :  { %3290 = shalt.err (!%p3287_p7)
}
 0x4f7   :  { %2437 = dma.vmem_to_hbm [thread:$0]  %s2435_s26, 128, %s4343_s7, [#allocation3]  }
 0x4f8   :  { %3291 = dma.done.wait [#allocation3], 128  }
 0x4f9   :  { %3292 = vsyncadd [#allocation3], 4294967168 }
 0x4fa   :  { %2441 = vsyncpa [#allocation3], 1 }

</bundles_post_ra>
